<compile_context>
chip_gen: v5e
topology: v5e:2x2
jax: 0.10.0
libtpu: 0.0.40
codegen_flags: <defaults>
</compile_context>

<pallas_src>
import functools

import jax
import jax.numpy as jnp
from jax import lax
from jax.experimental import pallas as pl
from jax.experimental.pallas import tpu as pltpu

ALPHA = 0.25
GAMMA = 2.0
EPS = 1e-8

LANES = 128             # vreg lane width: lane-dense last dim
MAX_BLOCK_ROWS = 2048   # 2048*128*4 B = 1 MiB per f32 input tile per buffer
NUM_CORES = 2           # megacore split (v7x has 2 TCs); harmless on v5e/v6e


def _round_up(x, m):
    return (x + m - 1) // m * m


def _sublane_multiple(dtype):
    # Second-to-last block dim must be a multiple of 8 (4B), 16 (2B), 32 (1B).
    return {4: 8, 2: 16, 1: 32}[jnp.dtype(dtype).itemsize]


def _focal_loss_kernel(x_ref, t_ref, acc_ref, *, alpha, gamma, total_rows,
                       block_rows, steps, steps_per_core):
    """One grid step = one (block_rows, 128) tile of the lane-dense problem.

    Grid is (num_cores, steps_per_core): axis 0 is 'parallel' (megacore on
    v7x), axis 1 is the serial streaming/reduction axis.  acc_ref is a
    per-core resident (8, 128) f32 accumulator (its output block index depends
    only on the core index), zeroed at each core's first step.
    """
    c = pl.program_id(0)
    i = pl.program_id(1)

    @pl.when(i == 0)
    def _init():
        acc_ref[...] = jnp.zeros_like(acc_ref)

    x = x_ref[...].astype(jnp.float32)
    t = t_ref[...].astype(jnp.float32)

    # Single-log focal loss (exact for binary {0,1} targets):
    #   pt   = p  if t == 1 else 1 - p
    #   bce  = -log(pt)
    #   loss = alpha * (1 - pt)**gamma * bce
    # Matches the PyTorch forward everywhere it is finite; where torch would
    # hit 0*log(0)=NaN / log(0)=inf (p saturated at 1.0), the EPS clamp on pt
    # keeps the result finite instead.  Zero-padded elements (x=0, t=0) give
    # pt=1 -> loss exactly 0, so lane padding needs no extra mask.
    pt = jnp.where(t == 1.0, x, 1.0 - x)
    pt = jnp.clip(pt, EPS, 1.0)
    one_minus_pt = 1.0 - pt
    bce = -jnp.log(pt)                        # one EUP log per element
    if gamma == 2.0:
        focal = one_minus_pt * one_minus_pt   # VPU mul, no pow (log+exp)
    else:
        focal = one_minus_pt ** gamma
    loss = alpha * focal * bce

    def _accumulate(vals):
        # Sublane-split reshape stays on (8,128) tile boundaries -> free; the
        # reduce over tile groups is pure VPU vreg adds (no XLU sublane crush).
        acc_ref[...] += vals.reshape(block_rows // 8, 8, LANES).sum(axis=0)

    global_step = c * steps_per_core + i
    is_edge = global_step >= steps - 1   # ragged last block or phantom step

    @pl.when(jnp.logical_not(is_edge))
    def _full_block():
        _accumulate(loss)

    @pl.when(is_edge)
    def _ragged_block():
        # Mask rows past the end of the row-array.  Only paid on the final
        # (and any phantom megacore) step; block-local indices -> no int32
        # flat-index overflow for huge n.
        valid = total_rows - global_step * block_rows   # may be <= 0 (phantom)
        row_ids = lax.broadcasted_iota(jnp.int32, (block_rows, LANES), 0)
        _accumulate(jnp.where(row_ids < valid, loss, 0.0))


def focal_loss(inputs, targets, alpha=ALPHA, gamma=GAMMA, reduction="mean"):
    """inputs, targets: same-shape float arrays (f32 or bf16). Returns scalar."""
    if reduction not in ("mean", "sum"):
        # TODO(synk): reduction='none' needs an element-wise output BlockSpec; not implemented.
        raise NotImplementedError("only 'mean' and 'sum' reductions are implemented")

    n = int(inputs.size)
    x = inputs.reshape(-1)
    t = targets.reshape(-1)

    rows = pl.cdiv(n, LANES)
    row_align = max(_sublane_multiple(x.dtype), _sublane_multiple(t.dtype))

    if rows <= MAX_BLOCK_ROWS:
        # Single block (per core): round rows up to the sublane multiple so the
        # block equals the (tiny, padded) array and the (8,128) rule holds.
        block_rows = _round_up(max(rows, row_align), row_align)
        rows_p = block_rows
    else:
        block_rows = MAX_BLOCK_ROWS   # multiple of 8/16/32 for any dtype
        rows_p = rows                 # no row padding: ragged last block is masked in-kernel

    # Pad only to the lane boundary (tiny), never to a block_rows multiple:
    # the ragged last *block* is handled by the in-kernel row mask, and the
    # zero-padded lane tail contributes exactly zero loss.
    pad = rows_p * LANES - n
    if pad:
        x = jnp.pad(x, (0, pad))
        t = jnp.pad(t, (0, pad))
    x = x.reshape(rows_p, LANES)
    t = t.reshape(rows_p, LANES)

    steps = pl.cdiv(rows_p, block_rows)
    num_cores = NUM_CORES if steps >= NUM_CORES else 1
    steps_per_core = pl.cdiv(steps, num_cores)

    kernel = functools.partial(
        _focal_loss_kernel,
        alpha=float(alpha),
        gamma=float(gamma),
        total_rows=rows_p,
        block_rows=block_rows,
        steps=steps,
        steps_per_core=steps_per_core,
    )

    def in_map(c, i):
        # Clamp phantom megacore steps onto the last real block; their rows
        # are fully masked in-kernel, so they contribute exactly zero.
        return (jnp.minimum(c * steps_per_core + i, steps - 1), 0)

    partial = pl.pallas_call(
        kernel,
        out_shape=jax.ShapeDtypeStruct((num_cores, 8, LANES), jnp.float32),
        grid_spec=pltpu.PrefetchScalarGridSpec(
            num_scalar_prefetch=0,
            grid=(num_cores, steps_per_core),
            in_specs=[
                pl.BlockSpec((block_rows, LANES), in_map),
                pl.BlockSpec((block_rows, LANES), in_map),
            ],
            out_specs=pl.BlockSpec((None, 8, LANES), lambda c, i: (c, 0, 0)),
        ),
        compiler_params=pltpu.CompilerParams(
            dimension_semantics=("parallel", "arbitrary"),
            vmem_limit_bytes=32 * 1024 * 1024,   # safe on v5e/v6e/v7x
        ),
    )(x, t)

    total = jnp.sum(partial)   # one small final reduce, outside the hot loop
    if reduction == "mean":
        return total / jnp.float32(n)
    return total


def focal_loss_ref(inputs, targets, alpha=ALPHA, gamma=GAMMA):
    # Pure-JAX reference mirroring the PyTorch forward (reduction='mean').
    x = jnp.clip(inputs.astype(jnp.float32), EPS, 1.0 - EPS)
    t = targets.astype(jnp.float32)
    bce = -(t * jnp.log(x) + (1.0 - t) * jnp.log(1.0 - x))
    pt = jnp.where(t == 1.0, x, 1.0 - x)
    loss = alpha * (1.0 - pt) ** gamma * bce
    return loss.mean()


if __name__ == "__main__":
    key = jax.random.PRNGKey(0)
    k1, k2, k3, k4, k5, k6 = jax.random.split(key, 6)

    # 1) Small (B, C) case matching the module interface (single-block path).
    B, C = 8, 16
    inputs = jax.nn.sigmoid(jax.random.normal(k1, (B, C), dtype=jnp.float32))
    targets = (jax.random.uniform(k2, (B, C)) > 0.5).astype(jnp.float32)
    out = jax.block_until_ready(focal_loss(inputs, targets))
    ref = focal_loss_ref(inputs, targets)
    assert jnp.allclose(out, ref, rtol=1e-5, atol=1e-6), (out, ref)

    # 2) Larger case exercising the streaming grid, megacore split, lane-tail
    #    padding and the masked ragged last block (n = 630700 -> rows = 4928,
    #    3 real blocks of 2048 rows across 2 "cores" + 1 phantom step).
    B2, C2 = 700, 901
    inputs2 = jax.nn.sigmoid(jax.random.normal(k3, (B2, C2), dtype=jnp.float32))
    targets2 = (jax.random.uniform(k4, (B2, C2)) > 0.5).astype(jnp.float32)
    out2 = jax.block_until_ready(focal_loss(inputs2, targets2))
    ref2 = focal_loss_ref(inputs2, targets2)
    assert jnp.allclose(out2, ref2, rtol=1e-4, atol=1e-6), (out2, ref2)

    # 3) bf16 inputs/targets (accepted directly; 16-row sublane alignment).
    B3, C3 = 48, 40
    inputs3 = jax.nn.sigmoid(jax.random.normal(k5, (B3, C3))).astype(jnp.bfloat16)
    targets3 = (jax.random.uniform(k6, (B3, C3)) > 0.5).astype(jnp.bfloat16)
    out3 = jax.block_until_ready(focal_loss(inputs3, targets3))
    ref3 = focal_loss_ref(inputs3, targets3)
    assert jnp.allclose(out3, ref3, rtol=1e-4, atol=1e-6), (out3, ref3)

    print("KERNEL_OK")
</pallas_src>

<mosaic_0001>
module attributes {stable_mosaic.version = 11 : i64} {
  func.func @_focal_loss_kernel(%arg0: i32, %arg1: i32, %arg2: memref<8x128xf32, #tpu.memory_space<vmem>>, %arg3: memref<8x128xf32, #tpu.memory_space<vmem>>, %arg4: memref<1x8x128xf32, #tpu.memory_space<vmem>>) attributes {dimension_semantics = [#tpu.dimension_semantics<parallel>, #tpu.dimension_semantics<arbitrary>], iteration_bounds = array<i64: 1, 1>, scalar_prefetch = 0 : i64, scratch_operands = 0 : i64, tpu.core_type = #tpu.core_type<tc>, window_params = [{transform_indices = @transform_0, window_bounds = array<i64: 8, 128>}, {transform_indices = @transform_1, window_bounds = array<i64: 8, 128>}, {transform_indices = @transform_2, window_bounds = array<i64: 1, 8, 128>}]} {
    %c0_i32 = arith.constant 0 : i32
    %0 = arith.cmpi eq, %arg1, %c0_i32 : i32
    %1 = arith.extui %0 : i1 to i32
    %c0_i32_0 = arith.constant 0 : i32
    %2 = arith.cmpi ne, %1, %c0_i32_0 : i32
    scf.if %2 {
      %cst_13 = arith.constant 0.000000e+00 : f32
      %31 = vector.broadcast %cst_13 : f32 to vector<8x128xf32>
      %c0_14 = arith.constant 0 : index
      %c0_15 = arith.constant 0 : index
      %c0_16 = arith.constant 0 : index
      %32 = vector.load %arg4[%c0_14, %c0_15, %c0_16] : memref<1x8x128xf32, #tpu.memory_space<vmem>>, vector<1x8x128xf32>
      %33 = vector.shape_cast %32 : vector<1x8x128xf32> to vector<8x128xf32>
      %34 = vector.shape_cast %31 : vector<8x128xf32> to vector<1x8x128xf32>
      tpu.vector_store %arg4[%c0_14, %c0_15, %c0_16], %34 {strides = array<i32>} : memref<1x8x128xf32, #tpu.memory_space<vmem>>, vector<1x8x128xf32>,
    } else {
    }
    %c0 = arith.constant 0 : index
    %c0_1 = arith.constant 0 : index
    %3 = vector.load %arg2[%c0, %c0_1] : memref<8x128xf32, #tpu.memory_space<vmem>>, vector<8x128xf32>
    %c0_2 = arith.constant 0 : index
    %c0_3 = arith.constant 0 : index
    %4 = vector.load %arg3[%c0_2, %c0_3] : memref<8x128xf32, #tpu.memory_space<vmem>>, vector<8x128xf32>
    %cst = arith.constant 1.000000e+00 : f32
    %5 = vector.broadcast %cst : f32 to vector<8x128xf32>
    %6 = arith.cmpf oeq, %4, %5 : vector<8x128xf32>
    %cst_4 = arith.constant 1.000000e+00 : f32
    %7 = vector.broadcast %cst_4 : f32 to vector<8x128xf32>
    %8 = arith.subf %7, %3 : vector<8x128xf32>
    %9 = arith.select %6, %3, %8 : vector<8x128xi1>, vector<8x128xf32>
    %cst_5 = arith.constant 9.99999993E-9 : f32
    %cst_6 = arith.constant 1.000000e+00 : f32
    %10 = vector.broadcast %cst_5 : f32 to vector<8x128xf32>
    %11 = arith.maximumf %10, %9 : vector<8x128xf32>
    %12 = vector.broadcast %cst_6 : f32 to vector<8x128xf32>
    %13 = arith.minimumf %12, %11 : vector<8x128xf32>
    %cst_7 = arith.constant 1.000000e+00 : f32
    %14 = vector.broadcast %cst_7 : f32 to vector<8x128xf32>
    %15 = arith.subf %14, %13 : vector<8x128xf32>
    %16 = math.log %13 : vector<8x128xf32>
    %cst_8 = arith.constant 0.000000e+00 : f32
    %17 = vector.broadcast %cst_8 : f32 to vector<8x128xf32>
    %18 = arith.subf %17, %16 : vector<8x128xf32>
    %19 = arith.mulf %15, %15 : vector<8x128xf32>
    %cst_9 = arith.constant 2.500000e-01 : f32
    %20 = vector.broadcast %cst_9 : f32 to vector<8x128xf32>
    %21 = arith.mulf %20, %19 : vector<8x128xf32>
    %22 = arith.mulf %21, %18 : vector<8x128xf32>
    %c1_i32 = arith.constant 1 : i32
    %23 = arith.muli %arg0, %c1_i32 : i32
    %24 = arith.addi %23, %arg1 : i32
    %c0_i32_10 = arith.constant 0 : i32
    %25 = arith.cmpi sge, %24, %c0_i32_10 : i32
    %true = arith.constant true
    %26 = arith.xori %25, %true : i1
    %27 = arith.extui %26 : i1 to i32
    %c0_i32_11 = arith.constant 0 : i32
    %28 = arith.cmpi ne, %27, %c0_i32_11 : i32
    scf.if %28 {
      %c0_13 = arith.constant 0 : index
      %c0_14 = arith.constant 0 : index
      %c0_15 = arith.constant 0 : index
      %31 = vector.load %arg4[%c0_13, %c0_14, %c0_15] : memref<1x8x128xf32, #tpu.memory_space<vmem>>, vector<1x8x128xf32>
      %32 = vector.shape_cast %31 : vector<1x8x128xf32> to vector<8x128xf32>
      %33 = vector.shape_cast %22 : vector<8x128xf32> to vector<1x8x128xf32>
      %cst_16 = arith.constant dense<0.000000e+00> : vector<8x128xf32>
      %34 = vector.multi_reduction <add>, %33, %cst_16 [0] : vector<1x8x128xf32> to vector<8x128xf32>
      %35 = arith.addf %32, %34 : vector<8x128xf32>
      %c0_17 = arith.constant 0 : index
      %c0_18 = arith.constant 0 : index
      %c0_19 = arith.constant 0 : index
      %36 = vector.load %arg4[%c0_17, %c0_18, %c0_19] : memref<1x8x128xf32, #tpu.memory_space<vmem>>, vector<1x8x128xf32>
      %37 = vector.shape_cast %36 : vector<1x8x128xf32> to vector<8x128xf32>
      %38 = vector.shape_cast %35 : vector<8x128xf32> to vector<1x8x128xf32>
      tpu.vector_store %arg4[%c0_17, %c0_18, %c0_19], %38 {strides = array<i32>} : memref<1x8x128xf32, #tpu.memory_space<vmem>>, vector<1x8x128xf32>,
    } else {
    }
    %29 = arith.extui %25 : i1 to i32
    %c0_i32_12 = arith.constant 0 : i32
    %30 = arith.cmpi ne, %29, %c0_i32_12 : i32
    scf.if %30 {
      %c8_i32 = arith.constant 8 : i32
      %31 = arith.muli %24, %c8_i32 : i32
      %c8_i32_13 = arith.constant 8 : i32
      %32 = arith.subi %c8_i32_13, %31 : i32
      %33 = tpu.iota {dimensions = array<i32: 0>} : vector<8x128xi32>
      %34 = vector.broadcast %32 : i32 to vector<8x128xi32>
      %35 = arith.cmpi slt, %33, %34 : vector<8x128xi32>
      %cst_14 = arith.constant 0.000000e+00 : f32
      %36 = vector.broadcast %cst_14 : f32 to vector<8x128xf32>
      %37 = arith.select %35, %22, %36 : vector<8x128xi1>, vector<8x128xf32>
      %c0_15 = arith.constant 0 : index
      %c0_16 = arith.constant 0 : index
      %c0_17 = arith.constant 0 : index
      %38 = vector.load %arg4[%c0_15, %c0_16, %c0_17] : memref<1x8x128xf32, #tpu.memory_space<vmem>>, vector<1x8x128xf32>
      %39 = vector.shape_cast %38 : vector<1x8x128xf32> to vector<8x128xf32>
      %40 = vector.shape_cast %37 : vector<8x128xf32> to vector<1x8x128xf32>
      %cst_18 = arith.constant dense<0.000000e+00> : vector<8x128xf32>
      %41 = vector.multi_reduction <add>, %40, %cst_18 [0] : vector<1x8x128xf32> to vector<8x128xf32>
      %42 = arith.addf %39, %41 : vector<8x128xf32>
      %c0_19 = arith.constant 0 : index
      %c0_20 = arith.constant 0 : index
      %c0_21 = arith.constant 0 : index
      %43 = vector.load %arg4[%c0_19, %c0_20, %c0_21] : memref<1x8x128xf32, #tpu.memory_space<vmem>>, vector<1x8x128xf32>
      %44 = vector.shape_cast %43 : vector<1x8x128xf32> to vector<8x128xf32>
      %45 = vector.shape_cast %42 : vector<8x128xf32> to vector<1x8x128xf32>
      tpu.vector_store %arg4[%c0_19, %c0_20, %c0_21], %45 {strides = array<i32>} : memref<1x8x128xf32, #tpu.memory_space<vmem>>, vector<1x8x128xf32>,
    } else {
    }
    return
  }
  func.func @transform_0(%arg0: i32, %arg1: i32) -> (i32, i32) {
    %c1_i32 = arith.constant 1 : i32
    %0 = arith.muli %arg0, %c1_i32 : i32
    %1 = arith.addi %0, %arg1 : i32
    %c0_i32 = arith.constant 0 : i32
    %2 = arith.minsi %1, %c0_i32 : i32
    %c0_i32_0 = arith.constant 0 : i32
    %c0_i32_1 = arith.constant 0 : i32
    return %2, %c0_i32_0 : i32, i32
  }
  func.func @transform_1(%arg0: i32, %arg1: i32) -> (i32, i32) {
    %c1_i32 = arith.constant 1 : i32
    %0 = arith.muli %arg0, %c1_i32 : i32
    %1 = arith.addi %0, %arg1 : i32
    %c0_i32 = arith.constant 0 : i32
    %2 = arith.minsi %1, %c0_i32 : i32
    %c0_i32_0 = arith.constant 0 : i32
    %c0_i32_1 = arith.constant 0 : i32
    return %2, %c0_i32_0 : i32, i32
  }
  func.func @transform_2(%arg0: i32, %arg1: i32) -> (i32, i32, i32) {
    %c0_i32 = arith.constant 0 : i32
    %c0_i32_0 = arith.constant 0 : i32
    %c0_i32_1 = arith.constant 0 : i32
    return %arg0, %c0_i32, %c0_i32_0 : i32, i32, i32
  }
}

</mosaic_0001>

<bundles_post_ra>
// kernel: tpu_custom_call.1
= control target key start
LH: loop header
LB: loop body
LE: loop exit
PB: predicated region body
PF: predicated region fallthrough
CT: control target
= control target key end

     0   :  { %7 = vsyncpa [#allocation3], 0  ;;  %s232_s0 = inlined_call_operand.hbm [shape: f32[8,128], index: 0, kind: input, shape index: {}]   ;;  %s233_s1 = inlined_call_operand.hbm [shape: f32[8,128], index: 1, kind: input, shape index: {}]   ;;  %s234_s2 = inlined_call_operand.hbm [shape: f32[1,8,128], index: 2, kind: output, shape index: {}]  }
   0x1   :  { %8 = vsyncpa [#allocation6], 0 }
   0x2   :  { %9 = vsyncpa [#allocation4], 0  ;;  %s20_s11 = sshll.u32 %s232_s0, 4  ;;  %s205_s12 = smov [#allocation2]   ;;  %s21_s11 = int_to_ptr.hbm [resolvable:$true] %s20_s11 }
   0x3   :  { %s22_s13 = sshll.u32 %s205_s12, 4  ;;  %s36_s16 = sshll.u32 %s233_s1, 4  ;;  %s23_s13 = int_to_ptr.vmem [resolvable:$true] %s22_s13  ;;  %s37_s16 = int_to_ptr.hbm [resolvable:$true] %s36_s16 }
   0x4   :  { %25 = dma.hbm_to_vmem [thread:$0]  %s21_s11, 128, %s23_s13, [#allocation3]  }
   0x5   :  { %s206_s17 = smov [#allocation5]  }
   0x6   :  { %s38_s18 = sshll.u32 %s206_s17, 4  ;;  %s39_s18 = int_to_ptr.vmem [resolvable:$true] %s38_s18 }
   0x7   :  { %41 = dma.hbm_to_vmem [thread:$0]  %s37_s16, 128, %s39_s18, [#allocation6]  }
   0x8   :  { %199 = dma.done.wait [#allocation3], 128  }
   0x9   :  { %200 = vsyncadd [#allocation3], 4294967168 }
   0xa   :  { %201 = dma.done.wait [#allocation6], 128  }
   0xb   :  { %202 = vsyncadd [#allocation6], 4294967168  ;;  %v61_v0 = vld [vmem:[#allocation2] sm:$0xff]  ;;  %v62_v1 = vld [vmem:[#allocation5] sm:$0xff]  ;;  %s207_s0 = smov [#allocation7]   ;;  %s106_s21 = sshll.u32 %s234_s2, 4  ;;  %s107_s21 = int_to_ptr.hbm [resolvable:$true] %s106_s21 }
   0xc   :  { %vm63_vm0 = vcmp.eq.f32.partialorder %v62_v1, 1.0  ;;  %v64_v2 = vsub.f32 1.0, %v61_v0  ;;  %s104_s1 = sshll.u32 %s207_s0, 4  ;;  %s105_s1 = int_to_ptr.vmem [resolvable:$true] %s104_s1 }
   0xe   :  { %v65_v3 = vsel %vm63_vm0, %v61_v0, %v64_v2 }
   0xf   :  { %v66_v4 = vmax.f32 %v65_v3, 1e-08 }
  0x11   :  { %v67_v5 = vmin.f32 %v66_v4, 1.0 }
  0x13   :  { %v68_v6 = vsub.f32 1.0, %v67_v5  ;;  %125 = vlog2.f32 %v67_v5 }
  0x15   :  { %v72_v7 = vmul.f32 %v68_v6, %v68_v6 }
  0x17   :  { %v73_v10 = vmul.f32 0.25, %v72_v7 }
  0x19   :  { %v126_v8 = vpop.eup %125 }
  0x1a   :  { %v70_v9 = vmul.f32 0.6931472, %v126_v8 }
  0x1c   :  { %v71_v11 = vsub.f32 0.0, %v70_v9 }
  0x1e   :  { %v74_v12 = vmul.f32 %v73_v10, %v71_v11 }
  0x20   :  { %98 = vst [vmem:[#allocation7] sm:$0xff] %v74_v12 }
  0x21   :  { %109 = dma.vmem_to_hbm [thread:$0]  %s105_s1, 128, %s107_s21, [#allocation4]  }
  0x22   :  { %203 = dma.done.wait [#allocation4], 128  }
  0x23   :  { %204 = vsyncadd [#allocation4], 4294967168 }
  0x24   :  { %114 = vsyncpa [#allocation3], 1 }
  0x25   :  { %115 = vsyncpa [#allocation6], 1 }
  0x26   :  { %116 = vsyncpa [#allocation4], 1 }

</bundles_post_ra>
